<compile_context>
chip_gen: v6e
topology: v6e:2x2x1
jax: 0.10.0
libtpu: 0.0.40
codegen_flags: <defaults>
</compile_context>

<pallas_src>
import functools

import jax
import jax.numpy as jnp
from jax.experimental import pallas as pl
from jax.experimental.pallas import tpu as pltpu


def _gal_kernel(idx_i_ref, idx_j_ref, wh_ref, e_ref, o_ref, *, neg_slope):
    """One (batch, N-tile) per grid step.

    idx_i_ref : [1, TN, K]  int32  edge_index[1] (query-side gather indices)
    idx_j_ref : [1, TN, K]  int32  edge_index[0] (neighbor gather indices)
    wh_ref    : [1, Ns, Cp] bf16/f32  precomputed W(x), channel-padded
    e_ref     : [1, 2, Ns]  f32    row 0 = e_i = wh@a_i, row 1 = e_j = wh@a_j
    o_ref     : [1, TN, Cp] f32    output tile (lane-dense, padded channels)
    """
    idx_i = idx_i_ref[0]                         # [TN, K]
    idx_j = idx_j_ref[0]                         # [TN, K]
    wh = wh_ref[0]                               # [Ns, Cp]
    e2 = e_ref[0]                                # [2, Ns] f32
    TN, K = idx_i.shape
    Ns = wh.shape[0]

    # Lane-axis iota over source vertices; the per-vertex logit rows are
    # broadcast to the tile ONCE (hoisted: JAX does not CSE broadcast_in_dim).
    iota = jax.lax.broadcasted_iota(jnp.int32, (TN, Ns), 1)
    e_i_b = jnp.broadcast_to(e2[0:1, :], (TN, Ns))          # [TN, Ns] f32
    e_j_b = jnp.broadcast_to(e2[1:2, :], (TN, Ns))          # [TN, Ns] f32

    # ---- Pass 1: logits per neighbor slot via compare + select + lane
    # reduce (XLU); keeps the MXU free and never builds f32 one-hots.
    # (K is small; static unroll keeps only short-lived [TN,Ns] temporaries.)
    logit_cols = []
    for k in range(K):
        sel = (jnp.where(idx_i[:, k:k + 1] == iota, e_i_b, 0.0)
               + jnp.where(idx_j[:, k:k + 1] == iota, e_j_b, 0.0))
        s = jnp.sum(sel, axis=-1, keepdims=True)            # [TN, 1]
        logit_cols.append(jnp.maximum(s, neg_slope * s))    # LeakyReLU(0.2)

    # Softmax over K on tiny [TN, 1] columns (no [TN, Ns] rescaling).
    m = logit_cols[0]
    for k in range(1, K):
        m = jnp.maximum(m, logit_cols[k])
    p_cols = [jnp.exp(c - m) for c in logit_cols]            # K x [TN, 1]
    denom = p_cols[0]
    for k in range(1, K):
        denom = denom + p_cols[k]

    # ---- Pass 2: accumulate the unnormalized attention matrix with
    # compare + select + add (no one-hot cast, no extra multiply).
    att = jnp.zeros((TN, Ns), dtype=wh.dtype)
    zero = jnp.zeros((), dtype=wh.dtype)
    for k in range(K):
        pk = p_cols[k].astype(wh.dtype)                      # [TN, 1]
        att = att + jnp.where(idx_j[:, k:k + 1] == iota, pk, zero)

    # Single MXU aggregation matmul (f32 accumulation); normalize afterwards.
    out = jnp.dot(att, wh, preferred_element_type=jnp.float32)   # [TN, Cp]
    out = out * (1.0 / denom)
    o_ref[0] = out.astype(o_ref.dtype)


def _round_up(v, m):
    return (v + m - 1) // m * m


def _vmem_limit_bytes(Ns, Cp, TN, K, compute_itemsize):
    """Rough per-step working-set estimate (double-buffered pipelined blocks)."""
    ns8, tn8 = _round_up(Ns, 8), _round_up(TN, 8)
    ns128, k128 = _round_up(Ns, 128), _round_up(K, 128)
    inputs = 2 * (ns8 * Cp * compute_itemsize          # wh gather source
                  + 8 * ns128 * 4                      # e (2 rows -> 8 sublanes)
                  + 2 * tn8 * k128 * 4)                # idx_i + idx_j
    outputs = 2 * tn8 * Cp * 4
    temps = 6 * tn8 * ns128 * 4                        # iota, e_*_b, att, selects
    need = inputs + outputs + temps
    # Raise above v5e's 16 MiB scoped default; stay below v7x's 64 MiB physical.
    return int(min(max(1.4 * need, 32 * 2 ** 20), 60 * 2 ** 20))


def gal_forward(x_nchw, edge_index, w_conv, a_conv, y_nchw=None, *,
                tile_n=256, compute_dtype=jnp.bfloat16):
    """GAL forward.

    x_nchw:     [B, C, N, 1]  float32
    edge_index: [2, B, N, K]  (edge_index[0]=neighbor idx, [1]=query idx)
    w_conv:     [C, C]   PyTorch Conv2d-1x1 weight of W (out_ch, in_ch), no bias
    a_conv:     [1, 2C]  PyTorch Conv2d-1x1 weight of a (out_ch=1, in_ch=2C)
    compute_dtype: dtype of the gather source wh and the attention matrix
        (bf16 = fast MXU/VMEM path; f32 = exact reference agreement).
    returns     [B, C, N, 1] float32
    """
    if y_nchw is not None:
        # TODO(synk): the upstream `y is not None` branch references an
        # undefined `whj`; only the y=None path is implemented.
        raise NotImplementedError("GAL y!=None path is broken upstream")

    B, C, N, _ = x_nchw.shape
    K = edge_index.shape[-1]
    hi = jax.lax.Precision.HIGHEST

    # Channels-last; wh and the per-vertex attention logits are computed ONCE
    # per batch here (plain XLA einsums) instead of once per N-tile in-kernel.
    x_bnc = jnp.transpose(x_nchw[..., 0], (0, 2, 1)).astype(jnp.float32)
    wh = jnp.einsum('bnc,oc->bno', x_bnc, w_conv.astype(jnp.float32),
                    precision=hi)                                   # [B, N, C]
    a_i = a_conv[0, :C].astype(jnp.float32)
    a_j = a_conv[0, C:].astype(jnp.float32)
    e = jnp.stack([jnp.einsum('bno,o->bn', wh, a_i, precision=hi),
                   jnp.einsum('bno,o->bn', wh, a_j, precision=hi)],
                  axis=1)                                           # [B, 2, N]

    # Pad wh's channels to a lane-dense multiple of 128; cast the gather
    # source to the compute dtype (bf16 halves VMEM + K-loop ld/st bytes).
    Cp = _round_up(C, 128)
    wh_p = jnp.pad(wh, ((0, 0), (0, 0), (0, Cp - C))).astype(compute_dtype)

    # N tiling (bounds the [TN, Ns] working set; gives grid parallelism).
    if N <= tile_n:
        TN, Npad = N, N
    else:
        TN = _round_up(tile_n, 8)
        Npad = _round_up(N, TN)
    n_tiles = Npad // TN

    idx = edge_index.astype(jnp.int32)
    idx_j = idx[0]                                                  # [B, N, K]
    idx_i = idx[1]                                                  # [B, N, K]
    if Npad != N:
        pad = ((0, 0), (0, Npad - N), (0, 0))
        idx_j = jnp.pad(idx_j, pad)       # padded rows are sliced off below
        idx_i = jnp.pad(idx_i, pad)

    kernel = functools.partial(_gal_kernel, neg_slope=0.2)
    vmem_limit = _vmem_limit_bytes(N, Cp, TN, K,
                                   jnp.dtype(compute_dtype).itemsize)

    out_pad = pl.pallas_call(
        kernel,
        out_shape=jax.ShapeDtypeStruct((B, Npad, Cp), jnp.float32),
        grid=(B, n_tiles),
        in_specs=[
            pl.BlockSpec((1, TN, K), lambda b, t: (b, t, 0)),   # idx_i
            pl.BlockSpec((1, TN, K), lambda b, t: (b, t, 0)),   # idx_j
            # Per-batch gather source / logit rows (invariant over t, so they
            # are only re-fetched when b changes).
            pl.BlockSpec((1, N, Cp), lambda b, t: (b, 0, 0)),   # wh
            pl.BlockSpec((1, 2, N), lambda b, t: (b, 0, 0)),    # e_i / e_j
        ],
        out_specs=pl.BlockSpec((1, TN, Cp), lambda b, t: (b, t, 0)),
        compiler_params=pltpu.CompilerParams(
            dimension_semantics=("parallel", "parallel"),
            vmem_limit_bytes=vmem_limit),
    )(idx_i, idx_j, wh_p, e)

    out = out_pad[:, :N, :C]                                        # [B, N, C]
    return jnp.transpose(out, (0, 2, 1))[..., None]                 # [B, C, N, 1]


def gal_reference(x_nchw, edge_index, w_conv, a_conv):
    """Pure-JAX reference mirroring the PyTorch forward (eval mode)."""
    x = x_nchw[..., 0]                                       # [B, C, N]
    wh = jnp.einsum('oc,bcn->bon', w_conv, x)                # [B, C, N]
    idx_j = edge_index[0]                                    # [B, N, K]
    idx_i = edge_index[1]                                    # [B, N, K]
    gather = jax.vmap(lambda whb, ib: whb[:, ib])            # -> [C, N, K]
    whi = gather(wh, idx_i)                                  # [B, C, N, K]
    whj = gather(wh, idx_j)                                  # [B, C, N, K]
    cat = jnp.concatenate([whi, whj], axis=1)                # [B, 2C, N, K]
    Eij = jnp.einsum('c,bcnk->bnk', a_conv[0], cat)[:, None]  # [B, 1, N, K]
    Eij = jnp.where(Eij >= 0, Eij, 0.2 * Eij)                # LeakyReLU(0.2)
    Aij = jax.nn.softmax(Eij, axis=-1)                       # softmax over K
    h_j = whj * Aij                                          # [B, C, N, K]
    return jnp.sum(h_j, axis=-1, keepdims=True)              # [B, C, N, 1]


if __name__ == "__main__":
    B, C, N, K = 2, 4, 16, 8

    key = jax.random.PRNGKey(0)
    kx, ke, kw, ka = jax.random.split(key, 4)

    x = jax.random.normal(kx, (B, C, N, 1), dtype=jnp.float32)
    edge_index = jax.random.randint(ke, (2, B, N, K), 0, N, dtype=jnp.int32)

    # PyTorch-layout 1x1 conv weights (no bias): W is [C_out=C, C_in=C],
    # a is [C_out=1, C_in=2C].
    w_conv = jax.random.normal(kw, (C, C), dtype=jnp.float32) * 0.5
    a_conv = jax.random.normal(ka, (1, 2 * C), dtype=jnp.float32) * 0.5

    ref = jax.block_until_ready(gal_reference(x, edge_index, w_conv, a_conv))

    # Exact f32 compute path.
    out_f32 = jax.block_until_ready(
        gal_forward(x, edge_index, w_conv, a_conv, compute_dtype=jnp.float32))
    assert out_f32.shape == (B, C, N, 1), out_f32.shape
    assert jnp.allclose(out_f32, ref, atol=1e-5, rtol=1e-5), float(
        jnp.max(jnp.abs(out_f32 - ref)))

    # Default bf16 compute path (wh / att in bf16, f32 MXU accumulation).
    out_bf16 = jax.block_until_ready(gal_forward(x, edge_index, w_conv, a_conv))
    assert jnp.allclose(out_bf16, ref, atol=5e-2, rtol=5e-2), float(
        jnp.max(jnp.abs(out_bf16 - ref)))

    # Exercise the N-tiling / padding path (N > tile_n).
    N2 = 40
    x2 = jax.random.normal(kx, (B, C, N2, 1), dtype=jnp.float32)
    ei2 = jax.random.randint(ke, (2, B, N2, K), 0, N2, dtype=jnp.int32)
    out2 = jax.block_until_ready(
        gal_forward(x2, ei2, w_conv, a_conv, tile_n=16,
                    compute_dtype=jnp.float32))
    ref2 = jax.block_until_ready(gal_reference(x2, ei2, w_conv, a_conv))
    assert jnp.allclose(out2, ref2, atol=1e-5, rtol=1e-5), float(
        jnp.max(jnp.abs(out2 - ref2)))

    print("KERNEL_OK")
</pallas_src>

<mosaic_0001>
module attributes {stable_mosaic.version = 11 : i64} {
  func.func @_gal_kernel(%arg0: i32, %arg1: i32, %arg2: memref<1x16x8xi32, #tpu.memory_space<vmem>>, %arg3: memref<1x16x8xi32, #tpu.memory_space<vmem>>, %arg4: memref<1x16x128xf32, #tpu.memory_space<vmem>>, %arg5: memref<1x2x16xf32, #tpu.memory_space<vmem>>, %arg6: memref<1x16x128xf32, #tpu.memory_space<vmem>>) attributes {dimension_semantics = [#tpu.dimension_semantics<parallel>, #tpu.dimension_semantics<parallel>], iteration_bounds = array<i64: 2, 1>, scalar_prefetch = 0 : i64, scratch_operands = 0 : i64, tpu.core_type = #tpu.core_type<tc>, window_params = [{transform_indices = @transform_0, window_bounds = array<i64: 1, 16, 8>}, {transform_indices = @transform_1, window_bounds = array<i64: 1, 16, 8>}, {transform_indices = @transform_2, window_bounds = array<i64: 1, 16, 128>}, {transform_indices = @transform_3, window_bounds = array<i64: 1, 2, 16>}, {transform_indices = @transform_4, window_bounds = array<i64: 1, 16, 128>}]} {
    %c0 = arith.constant 0 : index
    %c0_0 = arith.constant 0 : index
    %c0_1 = arith.constant 0 : index
    %0 = vector.load %arg2[%c0, %c0_0, %c0_1] : memref<1x16x8xi32, #tpu.memory_space<vmem>>, vector<1x16x8xi32>
    %1 = vector.shape_cast %0 : vector<1x16x8xi32> to vector<16x8xi32>
    %c0_2 = arith.constant 0 : index
    %c0_3 = arith.constant 0 : index
    %c0_4 = arith.constant 0 : index
    %2 = vector.load %arg3[%c0_2, %c0_3, %c0_4] : memref<1x16x8xi32, #tpu.memory_space<vmem>>, vector<1x16x8xi32>
    %3 = vector.shape_cast %2 : vector<1x16x8xi32> to vector<16x8xi32>
    %c0_5 = arith.constant 0 : index
    %c0_6 = arith.constant 0 : index
    %c0_7 = arith.constant 0 : index
    %4 = vector.load %arg4[%c0_5, %c0_6, %c0_7] : memref<1x16x128xf32, #tpu.memory_space<vmem>>, vector<1x16x128xf32>
    %5 = vector.shape_cast %4 : vector<1x16x128xf32> to vector<16x128xf32>
    %c0_8 = arith.constant 0 : index
    %c0_9 = arith.constant 0 : index
    %c0_10 = arith.constant 0 : index
    %6 = vector.load %arg5[%c0_8, %c0_9, %c0_10] : memref<1x2x16xf32, #tpu.memory_space<vmem>>, vector<1x2x16xf32>
    %7 = vector.shape_cast %6 : vector<1x2x16xf32> to vector<2x16xf32>
    %8 = tpu.iota {dimensions = array<i32: 1>} : vector<16x16xi32>
    %9 = vector.extract_strided_slice %7 {offsets = [0, 0], sizes = [1, 16], strides = [1, 1]} : vector<2x16xf32> to vector<1x16xf32>
    %10 = vector.shape_cast %9 : vector<1x16xf32> to vector<1x16xf32>
    %11 = vector.broadcast %10 : vector<1x16xf32> to vector<16x16xf32>
    %12 = vector.extract_strided_slice %7 {offsets = [1, 0], sizes = [1, 16], strides = [1, 1]} : vector<2x16xf32> to vector<1x16xf32>
    %13 = vector.shape_cast %12 : vector<1x16xf32> to vector<1x16xf32>
    %14 = vector.broadcast %13 : vector<1x16xf32> to vector<16x16xf32>
    %15 = vector.extract_strided_slice %1 {offsets = [0, 0], sizes = [16, 1], strides = [1, 1]} : vector<16x8xi32> to vector<16x1xi32>
    %16 = vector.broadcast %15 : vector<16x1xi32> to vector<16x16xi32>
    %17 = arith.cmpi eq, %16, %8 : vector<16x16xi32>
    %cst = arith.constant 0.000000e+00 : f32
    %18 = vector.broadcast %cst : f32 to vector<16x16xf32>
    %19 = arith.select %17, %11, %18 : vector<16x16xi1>, vector<16x16xf32>
    %20 = vector.extract_strided_slice %3 {offsets = [0, 0], sizes = [16, 1], strides = [1, 1]} : vector<16x8xi32> to vector<16x1xi32>
    %21 = vector.broadcast %20 : vector<16x1xi32> to vector<16x16xi32>
    %22 = arith.cmpi eq, %21, %8 : vector<16x16xi32>
    %cst_11 = arith.constant 0.000000e+00 : f32
    %23 = vector.broadcast %cst_11 : f32 to vector<16x16xf32>
    %24 = arith.select %22, %14, %23 : vector<16x16xi1>, vector<16x16xf32>
    %25 = arith.addf %19, %24 : vector<16x16xf32>
    %cst_12 = arith.constant dense<0.000000e+00> : vector<16xf32>
    %26 = vector.multi_reduction <add>, %25, %cst_12 [1] : vector<16x16xf32> to vector<16xf32>
    %27 = vector.shape_cast %26 : vector<16xf32> to vector<16x1xf32>
    %cst_13 = arith.constant 2.000000e-01 : f32
    %28 = vector.broadcast %cst_13 : f32 to vector<16x1xf32>
    %29 = arith.mulf %28, %27 : vector<16x1xf32>
    %30 = arith.maximumf %27, %29 : vector<16x1xf32>
    %31 = vector.extract_strided_slice %1 {offsets = [0, 1], sizes = [16, 1], strides = [1, 1]} : vector<16x8xi32> to vector<16x1xi32>
    %32 = vector.broadcast %31 : vector<16x1xi32> to vector<16x16xi32>
    %33 = arith.cmpi eq, %32, %8 : vector<16x16xi32>
    %cst_14 = arith.constant 0.000000e+00 : f32
    %34 = vector.broadcast %cst_14 : f32 to vector<16x16xf32>
    %35 = arith.select %33, %11, %34 : vector<16x16xi1>, vector<16x16xf32>
    %36 = vector.extract_strided_slice %3 {offsets = [0, 1], sizes = [16, 1], strides = [1, 1]} : vector<16x8xi32> to vector<16x1xi32>
    %37 = vector.broadcast %36 : vector<16x1xi32> to vector<16x16xi32>
    %38 = arith.cmpi eq, %37, %8 : vector<16x16xi32>
    %cst_15 = arith.constant 0.000000e+00 : f32
    %39 = vector.broadcast %cst_15 : f32 to vector<16x16xf32>
    %40 = arith.select %38, %14, %39 : vector<16x16xi1>, vector<16x16xf32>
    %41 = arith.addf %35, %40 : vector<16x16xf32>
    %cst_16 = arith.constant dense<0.000000e+00> : vector<16xf32>
    %42 = vector.multi_reduction <add>, %41, %cst_16 [1] : vector<16x16xf32> to vector<16xf32>
    %43 = vector.shape_cast %42 : vector<16xf32> to vector<16x1xf32>
    %cst_17 = arith.constant 2.000000e-01 : f32
    %44 = vector.broadcast %cst_17 : f32 to vector<16x1xf32>
    %45 = arith.mulf %44, %43 : vector<16x1xf32>
    %46 = arith.maximumf %43, %45 : vector<16x1xf32>
    %47 = vector.extract_strided_slice %1 {offsets = [0, 2], sizes = [16, 1], strides = [1, 1]} : vector<16x8xi32> to vector<16x1xi32>
    %48 = vector.broadcast %47 : vector<16x1xi32> to vector<16x16xi32>
    %49 = arith.cmpi eq, %48, %8 : vector<16x16xi32>
    %cst_18 = arith.constant 0.000000e+00 : f32
    %50 = vector.broadcast %cst_18 : f32 to vector<16x16xf32>
    %51 = arith.select %49, %11, %50 : vector<16x16xi1>, vector<16x16xf32>
    %52 = vector.extract_strided_slice %3 {offsets = [0, 2], sizes = [16, 1], strides = [1, 1]} : vector<16x8xi32> to vector<16x1xi32>
    %53 = vector.broadcast %52 : vector<16x1xi32> to vector<16x16xi32>
    %54 = arith.cmpi eq, %53, %8 : vector<16x16xi32>
    %cst_19 = arith.constant 0.000000e+00 : f32
    %55 = vector.broadcast %cst_19 : f32 to vector<16x16xf32>
    %56 = arith.select %54, %14, %55 : vector<16x16xi1>, vector<16x16xf32>
    %57 = arith.addf %51, %56 : vector<16x16xf32>
    %cst_20 = arith.constant dense<0.000000e+00> : vector<16xf32>
    %58 = vector.multi_reduction <add>, %57, %cst_20 [1] : vector<16x16xf32> to vector<16xf32>
    %59 = vector.shape_cast %58 : vector<16xf32> to vector<16x1xf32>
    %cst_21 = arith.constant 2.000000e-01 : f32
    %60 = vector.broadcast %cst_21 : f32 to vector<16x1xf32>
    %61 = arith.mulf %60, %59 : vector<16x1xf32>
    %62 = arith.maximumf %59, %61 : vector<16x1xf32>
    %63 = vector.extract_strided_slice %1 {offsets = [0, 3], sizes = [16, 1], strides = [1, 1]} : vector<16x8xi32> to vector<16x1xi32>
    %64 = vector.broadcast %63 : vector<16x1xi32> to vector<16x16xi32>
    %65 = arith.cmpi eq, %64, %8 : vector<16x16xi32>
    %cst_22 = arith.constant 0.000000e+00 : f32
    %66 = vector.broadcast %cst_22 : f32 to vector<16x16xf32>
    %67 = arith.select %65, %11, %66 : vector<16x16xi1>, vector<16x16xf32>
    %68 = vector.extract_strided_slice %3 {offsets = [0, 3], sizes = [16, 1], strides = [1, 1]} : vector<16x8xi32> to vector<16x1xi32>
    %69 = vector.broadcast %68 : vector<16x1xi32> to vector<16x16xi32>
    %70 = arith.cmpi eq, %69, %8 : vector<16x16xi32>
    %cst_23 = arith.constant 0.000000e+00 : f32
    %71 = vector.broadcast %cst_23 : f32 to vector<16x16xf32>
    %72 = arith.select %70, %14, %71 : vector<16x16xi1>, vector<16x16xf32>
    %73 = arith.addf %67, %72 : vector<16x16xf32>
    %cst_24 = arith.constant dense<0.000000e+00> : vector<16xf32>
    %74 = vector.multi_reduction <add>, %73, %cst_24 [1] : vector<16x16xf32> to vector<16xf32>
    %75 = vector.shape_cast %74 : vector<16xf32> to vector<16x1xf32>
    %cst_25 = arith.constant 2.000000e-01 : f32
    %76 = vector.broadcast %cst_25 : f32 to vector<16x1xf32>
    %77 = arith.mulf %76, %75 : vector<16x1xf32>
    %78 = arith.maximumf %75, %77 : vector<16x1xf32>
    %79 = vector.extract_strided_slice %1 {offsets = [0, 4], sizes = [16, 1], strides = [1, 1]} : vector<16x8xi32> to vector<16x1xi32>
    %80 = vector.broadcast %79 : vector<16x1xi32> to vector<16x16xi32>
    %81 = arith.cmpi eq, %80, %8 : vector<16x16xi32>
    %cst_26 = arith.constant 0.000000e+00 : f32
    %82 = vector.broadcast %cst_26 : f32 to vector<16x16xf32>
    %83 = arith.select %81, %11, %82 : vector<16x16xi1>, vector<16x16xf32>
    %84 = vector.extract_strided_slice %3 {offsets = [0, 4], sizes = [16, 1], strides = [1, 1]} : vector<16x8xi32> to vector<16x1xi32>
    %85 = vector.broadcast %84 : vector<16x1xi32> to vector<16x16xi32>
    %86 = arith.cmpi eq, %85, %8 : vector<16x16xi32>
    %cst_27 = arith.constant 0.000000e+00 : f32
    %87 = vector.broadcast %cst_27 : f32 to vector<16x16xf32>
    %88 = arith.select %86, %14, %87 : vector<16x16xi1>, vector<16x16xf32>
    %89 = arith.addf %83, %88 : vector<16x16xf32>
    %cst_28 = arith.constant dense<0.000000e+00> : vector<16xf32>
    %90 = vector.multi_reduction <add>, %89, %cst_28 [1] : vector<16x16xf32> to vector<16xf32>
    %91 = vector.shape_cast %90 : vector<16xf32> to vector<16x1xf32>
    %cst_29 = arith.constant 2.000000e-01 : f32
    %92 = vector.broadcast %cst_29 : f32 to vector<16x1xf32>
    %93 = arith.mulf %92, %91 : vector<16x1xf32>
    %94 = arith.maximumf %91, %93 : vector<16x1xf32>
    %95 = vector.extract_strided_slice %1 {offsets = [0, 5], sizes = [16, 1], strides = [1, 1]} : vector<16x8xi32> to vector<16x1xi32>
    %96 = vector.broadcast %95 : vector<16x1xi32> to vector<16x16xi32>
    %97 = arith.cmpi eq, %96, %8 : vector<16x16xi32>
    %cst_30 = arith.constant 0.000000e+00 : f32
    %98 = vector.broadcast %cst_30 : f32 to vector<16x16xf32>
    %99 = arith.select %97, %11, %98 : vector<16x16xi1>, vector<16x16xf32>
    %100 = vector.extract_strided_slice %3 {offsets = [0, 5], sizes = [16, 1], strides = [1, 1]} : vector<16x8xi32> to vector<16x1xi32>
    %101 = vector.broadcast %100 : vector<16x1xi32> to vector<16x16xi32>
    %102 = arith.cmpi eq, %101, %8 : vector<16x16xi32>
    %cst_31 = arith.constant 0.000000e+00 : f32
    %103 = vector.broadcast %cst_31 : f32 to vector<16x16xf32>
    %104 = arith.select %102, %14, %103 : vector<16x16xi1>, vector<16x16xf32>
    %105 = arith.addf %99, %104 : vector<16x16xf32>
    %cst_32 = arith.constant dense<0.000000e+00> : vector<16xf32>
    %106 = vector.multi_reduction <add>, %105, %cst_32 [1] : vector<16x16xf32> to vector<16xf32>
    %107 = vector.shape_cast %106 : vector<16xf32> to vector<16x1xf32>
    %cst_33 = arith.constant 2.000000e-01 : f32
    %108 = vector.broadcast %cst_33 : f32 to vector<16x1xf32>
    %109 = arith.mulf %108, %107 : vector<16x1xf32>
    %110 = arith.maximumf %107, %109 : vector<16x1xf32>
    %111 = vector.extract_strided_slice %1 {offsets = [0, 6], sizes = [16, 1], strides = [1, 1]} : vector<16x8xi32> to vector<16x1xi32>
    %112 = vector.broadcast %111 : vector<16x1xi32> to vector<16x16xi32>
    %113 = arith.cmpi eq, %112, %8 : vector<16x16xi32>
    %cst_34 = arith.constant 0.000000e+00 : f32
    %114 = vector.broadcast %cst_34 : f32 to vector<16x16xf32>
    %115 = arith.select %113, %11, %114 : vector<16x16xi1>, vector<16x16xf32>
    %116 = vector.extract_strided_slice %3 {offsets = [0, 6], sizes = [16, 1], strides = [1, 1]} : vector<16x8xi32> to vector<16x1xi32>
    %117 = vector.broadcast %116 : vector<16x1xi32> to vector<16x16xi32>
    %118 = arith.cmpi eq, %117, %8 : vector<16x16xi32>
    %cst_35 = arith.constant 0.000000e+00 : f32
    %119 = vector.broadcast %cst_35 : f32 to vector<16x16xf32>
    %120 = arith.select %118, %14, %119 : vector<16x16xi1>, vector<16x16xf32>
    %121 = arith.addf %115, %120 : vector<16x16xf32>
    %cst_36 = arith.constant dense<0.000000e+00> : vector<16xf32>
    %122 = vector.multi_reduction <add>, %121, %cst_36 [1] : vector<16x16xf32> to vector<16xf32>
    %123 = vector.shape_cast %122 : vector<16xf32> to vector<16x1xf32>
    %cst_37 = arith.constant 2.000000e-01 : f32
    %124 = vector.broadcast %cst_37 : f32 to vector<16x1xf32>
    %125 = arith.mulf %124, %123 : vector<16x1xf32>
    %126 = arith.maximumf %123, %125 : vector<16x1xf32>
    %127 = vector.extract_strided_slice %1 {offsets = [0, 7], sizes = [16, 1], strides = [1, 1]} : vector<16x8xi32> to vector<16x1xi32>
    %128 = vector.broadcast %127 : vector<16x1xi32> to vector<16x16xi32>
    %129 = arith.cmpi eq, %128, %8 : vector<16x16xi32>
    %cst_38 = arith.constant 0.000000e+00 : f32
    %130 = vector.broadcast %cst_38 : f32 to vector<16x16xf32>
    %131 = arith.select %129, %11, %130 : vector<16x16xi1>, vector<16x16xf32>
    %132 = vector.extract_strided_slice %3 {offsets = [0, 7], sizes = [16, 1], strides = [1, 1]} : vector<16x8xi32> to vector<16x1xi32>
    %133 = vector.broadcast %132 : vector<16x1xi32> to vector<16x16xi32>
    %134 = arith.cmpi eq, %133, %8 : vector<16x16xi32>
    %cst_39 = arith.constant 0.000000e+00 : f32
    %135 = vector.broadcast %cst_39 : f32 to vector<16x16xf32>
    %136 = arith.select %134, %14, %135 : vector<16x16xi1>, vector<16x16xf32>
    %137 = arith.addf %131, %136 : vector<16x16xf32>
    %cst_40 = arith.constant dense<0.000000e+00> : vector<16xf32>
    %138 = vector.multi_reduction <add>, %137, %cst_40 [1] : vector<16x16xf32> to vector<16xf32>
    %139 = vector.shape_cast %138 : vector<16xf32> to vector<16x1xf32>
    %cst_41 = arith.constant 2.000000e-01 : f32
    %140 = vector.broadcast %cst_41 : f32 to vector<16x1xf32>
    %141 = arith.mulf %140, %139 : vector<16x1xf32>
    %142 = arith.maximumf %139, %141 : vector<16x1xf32>
    %143 = arith.maximumf %30, %46 : vector<16x1xf32>
    %144 = arith.maximumf %143, %62 : vector<16x1xf32>
    %145 = arith.maximumf %144, %78 : vector<16x1xf32>
    %146 = arith.maximumf %145, %94 : vector<16x1xf32>
    %147 = arith.maximumf %146, %110 : vector<16x1xf32>
    %148 = arith.maximumf %147, %126 : vector<16x1xf32>
    %149 = arith.maximumf %148, %142 : vector<16x1xf32>
    %150 = arith.subf %30, %149 : vector<16x1xf32>
    %151 = math.exp %150 : vector<16x1xf32>
    %152 = arith.subf %46, %149 : vector<16x1xf32>
    %153 = math.exp %152 : vector<16x1xf32>
    %154 = arith.subf %62, %149 : vector<16x1xf32>
    %155 = math.exp %154 : vector<16x1xf32>
    %156 = arith.subf %78, %149 : vector<16x1xf32>
    %157 = math.exp %156 : vector<16x1xf32>
    %158 = arith.subf %94, %149 : vector<16x1xf32>
    %159 = math.exp %158 : vector<16x1xf32>
    %160 = arith.subf %110, %149 : vector<16x1xf32>
    %161 = math.exp %160 : vector<16x1xf32>
    %162 = arith.subf %126, %149 : vector<16x1xf32>
    %163 = math.exp %162 : vector<16x1xf32>
    %164 = arith.subf %142, %149 : vector<16x1xf32>
    %165 = math.exp %164 : vector<16x1xf32>
    %166 = arith.addf %151, %153 : vector<16x1xf32>
    %167 = arith.addf %166, %155 : vector<16x1xf32>
    %168 = arith.addf %167, %157 : vector<16x1xf32>
    %169 = arith.addf %168, %159 : vector<16x1xf32>
    %170 = arith.addf %169, %161 : vector<16x1xf32>
    %171 = arith.addf %170, %163 : vector<16x1xf32>
    %172 = arith.addf %171, %165 : vector<16x1xf32>
    %cst_42 = arith.constant 0.000000e+00 : f32
    %173 = vector.broadcast %cst_42 : f32 to vector<16x16xf32>
    %174 = vector.extract_strided_slice %3 {offsets = [0, 0], sizes = [16, 1], strides = [1, 1]} : vector<16x8xi32> to vector<16x1xi32>
    %175 = vector.broadcast %174 : vector<16x1xi32> to vector<16x16xi32>
    %176 = arith.cmpi eq, %175, %8 : vector<16x16xi32>
    %cst_43 = arith.constant 0.000000e+00 : f32
    %177 = vector.shape_cast %151 : vector<16x1xf32> to vector<16x1xf32>
    %178 = vector.broadcast %177 : vector<16x1xf32> to vector<16x16xf32>
    %179 = vector.broadcast %cst_43 : f32 to vector<16x16xf32>
    %180 = arith.select %176, %178, %179 : vector<16x16xi1>, vector<16x16xf32>
    %181 = arith.addf %173, %180 : vector<16x16xf32>
    %182 = vector.extract_strided_slice %3 {offsets = [0, 1], sizes = [16, 1], strides = [1, 1]} : vector<16x8xi32> to vector<16x1xi32>
    %183 = vector.broadcast %182 : vector<16x1xi32> to vector<16x16xi32>
    %184 = arith.cmpi eq, %183, %8 : vector<16x16xi32>
    %cst_44 = arith.constant 0.000000e+00 : f32
    %185 = vector.shape_cast %153 : vector<16x1xf32> to vector<16x1xf32>
    %186 = vector.broadcast %185 : vector<16x1xf32> to vector<16x16xf32>
    %187 = vector.broadcast %cst_44 : f32 to vector<16x16xf32>
    %188 = arith.select %184, %186, %187 : vector<16x16xi1>, vector<16x16xf32>
    %189 = arith.addf %181, %188 : vector<16x16xf32>
    %190 = vector.extract_strided_slice %3 {offsets = [0, 2], sizes = [16, 1], strides = [1, 1]} : vector<16x8xi32> to vector<16x1xi32>
    %191 = vector.broadcast %190 : vector<16x1xi32> to vector<16x16xi32>
    %192 = arith.cmpi eq, %191, %8 : vector<16x16xi32>
    %cst_45 = arith.constant 0.000000e+00 : f32
    %193 = vector.shape_cast %155 : vector<16x1xf32> to vector<16x1xf32>
    %194 = vector.broadcast %193 : vector<16x1xf32> to vector<16x16xf32>
    %195 = vector.broadcast %cst_45 : f32 to vector<16x16xf32>
    %196 = arith.select %192, %194, %195 : vector<16x16xi1>, vector<16x16xf32>
    %197 = arith.addf %189, %196 : vector<16x16xf32>
    %198 = vector.extract_strided_slice %3 {offsets = [0, 3], sizes = [16, 1], strides = [1, 1]} : vector<16x8xi32> to vector<16x1xi32>
    %199 = vector.broadcast %198 : vector<16x1xi32> to vector<16x16xi32>
    %200 = arith.cmpi eq, %199, %8 : vector<16x16xi32>
    %cst_46 = arith.constant 0.000000e+00 : f32
    %201 = vector.shape_cast %157 : vector<16x1xf32> to vector<16x1xf32>
    %202 = vector.broadcast %201 : vector<16x1xf32> to vector<16x16xf32>
    %203 = vector.broadcast %cst_46 : f32 to vector<16x16xf32>
    %204 = arith.select %200, %202, %203 : vector<16x16xi1>, vector<16x16xf32>
    %205 = arith.addf %197, %204 : vector<16x16xf32>
    %206 = vector.extract_strided_slice %3 {offsets = [0, 4], sizes = [16, 1], strides = [1, 1]} : vector<16x8xi32> to vector<16x1xi32>
    %207 = vector.broadcast %206 : vector<16x1xi32> to vector<16x16xi32>
    %208 = arith.cmpi eq, %207, %8 : vector<16x16xi32>
    %cst_47 = arith.constant 0.000000e+00 : f32
    %209 = vector.shape_cast %159 : vector<16x1xf32> to vector<16x1xf32>
    %210 = vector.broadcast %209 : vector<16x1xf32> to vector<16x16xf32>
    %211 = vector.broadcast %cst_47 : f32 to vector<16x16xf32>
    %212 = arith.select %208, %210, %211 : vector<16x16xi1>, vector<16x16xf32>
    %213 = arith.addf %205, %212 : vector<16x16xf32>
    %214 = vector.extract_strided_slice %3 {offsets = [0, 5], sizes = [16, 1], strides = [1, 1]} : vector<16x8xi32> to vector<16x1xi32>
    %215 = vector.broadcast %214 : vector<16x1xi32> to vector<16x16xi32>
    %216 = arith.cmpi eq, %215, %8 : vector<16x16xi32>
    %cst_48 = arith.constant 0.000000e+00 : f32
    %217 = vector.shape_cast %161 : vector<16x1xf32> to vector<16x1xf32>
    %218 = vector.broadcast %217 : vector<16x1xf32> to vector<16x16xf32>
    %219 = vector.broadcast %cst_48 : f32 to vector<16x16xf32>
    %220 = arith.select %216, %218, %219 : vector<16x16xi1>, vector<16x16xf32>
    %221 = arith.addf %213, %220 : vector<16x16xf32>
    %222 = vector.extract_strided_slice %3 {offsets = [0, 6], sizes = [16, 1], strides = [1, 1]} : vector<16x8xi32> to vector<16x1xi32>
    %223 = vector.broadcast %222 : vector<16x1xi32> to vector<16x16xi32>
    %224 = arith.cmpi eq, %223, %8 : vector<16x16xi32>
    %cst_49 = arith.constant 0.000000e+00 : f32
    %225 = vector.shape_cast %163 : vector<16x1xf32> to vector<16x1xf32>
    %226 = vector.broadcast %225 : vector<16x1xf32> to vector<16x16xf32>
    %227 = vector.broadcast %cst_49 : f32 to vector<16x16xf32>
    %228 = arith.select %224, %226, %227 : vector<16x16xi1>, vector<16x16xf32>
    %229 = arith.addf %221, %228 : vector<16x16xf32>
    %230 = vector.extract_strided_slice %3 {offsets = [0, 7], sizes = [16, 1], strides = [1, 1]} : vector<16x8xi32> to vector<16x1xi32>
    %231 = vector.broadcast %230 : vector<16x1xi32> to vector<16x16xi32>
    %232 = arith.cmpi eq, %231, %8 : vector<16x16xi32>
    %cst_50 = arith.constant 0.000000e+00 : f32
    %233 = vector.shape_cast %165 : vector<16x1xf32> to vector<16x1xf32>
    %234 = vector.broadcast %233 : vector<16x1xf32> to vector<16x16xf32>
    %235 = vector.broadcast %cst_50 : f32 to vector<16x16xf32>
    %236 = arith.select %232, %234, %235 : vector<16x16xi1>, vector<16x16xf32>
    %237 = arith.addf %229, %236 : vector<16x16xf32>
    %cst_51 = arith.constant dense<0.000000e+00> : vector<16x128xf32>
    %238 = tpu.matmul %237, %5, %cst_51 {dimension_numbers = #tpu.dot_dimension_numbers<[1], [0], [0], [1], [0, 0, 1, 1], [], []>} : vector<16x16xf32>, vector<16x128xf32>, vector<16x128xf32> -> vector<16x128xf32>
    %cst_52 = arith.constant 1.000000e+00 : f32
    %239 = vector.broadcast %cst_52 : f32 to vector<16x1xf32>
    %240 = arith.divf %239, %172 : vector<16x1xf32>
    %241 = vector.broadcast %240 : vector<16x1xf32> to vector<16x128xf32>
    %242 = arith.mulf %238, %241 : vector<16x128xf32>
    %c0_53 = arith.constant 0 : index
    %c0_54 = arith.constant 0 : index
    %c0_55 = arith.constant 0 : index
    %243 = vector.load %arg6[%c0_53, %c0_54, %c0_55] : memref<1x16x128xf32, #tpu.memory_space<vmem>>, vector<1x16x128xf32>
    %244 = vector.shape_cast %243 : vector<1x16x128xf32> to vector<16x128xf32>
    %245 = vector.shape_cast %242 : vector<16x128xf32> to vector<1x16x128xf32>
    tpu.vector_store %arg6[%c0_53, %c0_54, %c0_55], %245 {strides = array<i32>} : memref<1x16x128xf32, #tpu.memory_space<vmem>>, vector<1x16x128xf32>,
    return
  }
  func.func @transform_0(%arg0: i32, %arg1: i32) -> (i32, i32, i32) {
    %c0_i32 = arith.constant 0 : i32
    %c0_i32_0 = arith.constant 0 : i32
    return %arg0, %arg1, %c0_i32 : i32, i32, i32
  }
  func.func @transform_1(%arg0: i32, %arg1: i32) -> (i32, i32, i32) {
    %c0_i32 = arith.constant 0 : i32
    %c0_i32_0 = arith.constant 0 : i32
    return %arg0, %arg1, %c0_i32 : i32, i32, i32
  }
  func.func @transform_2(%arg0: i32, %arg1: i32) -> (i32, i32, i32) {
    %c0_i32 = arith.constant 0 : i32
    %c0_i32_0 = arith.constant 0 : i32
    %c0_i32_1 = arith.constant 0 : i32
    return %arg0, %c0_i32, %c0_i32_0 : i32, i32, i32
  }
  func.func @transform_3(%arg0: i32, %arg1: i32) -> (i32, i32, i32) {
    %c0_i32 = arith.constant 0 : i32
    %c0_i32_0 = arith.constant 0 : i32
    %c0_i32_1 = arith.constant 0 : i32
    return %arg0, %c0_i32, %c0_i32_0 : i32, i32, i32
  }
  func.func @transform_4(%arg0: i32, %arg1: i32) -> (i32, i32, i32) {
    %c0_i32 = arith.constant 0 : i32
    %c0_i32_0 = arith.constant 0 : i32
    return %arg0, %arg1, %c0_i32 : i32, i32, i32
  }
}

</mosaic_0001>

<bundles_post_ra>
// kernel: tpu_custom_call.1
= control target key start
LH: loop header
LB: loop body
LE: loop exit
PB: predicated region body
PF: predicated region fallthrough
CT: control target
= control target key end

     0   :  { %9 = vsyncpa [#allocation3], 0  ;;  %s1544_s0 = inlined_call_operand.vmem [shape: s32[2,16,8], index: 0, kind: input, shape index: {}]   ;;  %s1545_s1 = inlined_call_operand.vmem [shape: s32[2,16,8], index: 1, kind: input, shape index: {}]   ;;  %s1546_s2 = inlined_call_operand.vmem [shape: f32[2,16,128], index: 2, kind: input, shape index: {}]   ;;  %s1547_s3 = inlined_call_operand.vmem [shape: f32[2,2,16], index: 3, kind: input, shape index: {}]   ;;  %s1548_s4 = inlined_call_operand.hbm [shape: f32[2,16,128], index: 4, kind: output, shape index: {}]  }
   0x1   :  { %11 = vsyncpa [#allocation3 + $0x1], 0  ;;  %s1176_s15 = smov 0   ;;  %s1178_s16 = smov 0  }
   0x2   :  { %s1180_s17 = smov 0   ;;  %s1182_s18 = smov 0  }
   0x3   :  { %s1184_s19 = smov 0   ;;  %s1186_s20 = smov 0  }
   0x4 LB: > { %s908_s21 = sadd.s32 4294967295, %s1138_s20   ;;  %s909_s22 = sadd.s32 4294967294, %s1138_s20   ;;  %s1138_s20 = sphi %s1186_s20, %s17_s20   ;;  %s1134_s19 = sphi %s1184_s19, %s1559_s19   ;;  %s1130_s18 = sphi %s1182_s18, %s1558_s18   ;;  %s1126_s17 = sphi %s1180_s17, %s1557_s17   ;;  %s1122_s16 = sphi %s1178_s16, %s1556_s16   ;;  %s1118_s15 = sphi %s1176_s15, %s1555_s15  }
   0x5   : > { %s29_s23 = sadd.s32 1, %s1134_s19  ;;  %s146_s24 = sadd.s32 1, %s1126_s17 }
   0x6   : > { %p31_p0 = scmp.ge.s32.totalorder %s29_s23, 2  ;;  %p156_p1 = scmp.ne.s32.totalorder %s1126_s17, %s1122_s16 }
   0x7   : > { %p157_p2 = scmp.eq.s32.totalorder %s908_s21, 1  ;;  %p162_p3 = scmp.ne.s32.totalorder %s1122_s16, %s1118_s15 }
   0x8   : > { %s1561_s23 = smov (%p31_p0, %s29_s23), 0  ;;  %p163_p5 = scmp.eq.s32.totalorder %s909_s22, 1 }
   0x9   : > { %p1216_p4 = por %p157_p2, %p156_p1  ;;  %s141_s26 = ssub.s32 %s1134_s19, %s1561_s23 }
   0xa   : > { %p912_p6 = scmp.ge.s32.totalorder %s1138_s20, 1  ;;  %p144_p7 = scmp.eq.s32.totalorder %s141_s26, 0 }
   0xb   : > { %p1223_p8 = por %p163_p5, %p162_p3  ;;  %p222_p9 = scmp.lt.s32.totalorder %s1138_s20, 3 }
   0xc   : > { %s1229_s28 = scalar_select %p144_p7, %s1126_s17, %s146_s24  }
   0xd   : > { %p223_p10 = pnand %p912_p6, %p222_p9 }
   0xe   : > { %p271_p11 = scmp.lt.s32.totalorder (!%p223_p10), %s1130_s18, 1  ;;  %s267_s26 = sand.u32 (!%p223_p10), 1, %s1122_s16  }
   0xf   : > { %226 = sbr.rel (%p223_p10) target bundleno = 628 (0x274), region = 36  ;;  %s931_s6 = sshll.u32 (!%p223_p10), %s1130_s18, 8 }
  0x10   : > { %s1497_s9 = scalar_lea.hbm (!%p223_p10), %s1548_s4, %s931_s6 }
  0x14   : > { %v1140_v0 = vmov 0   ;;  %s1233_s29 = scalar_select %p271_p11, %s1130_s18, 1  ;;  %v1141_v4 = vmov 1   ;;  %v1142_v6 = vmov 2   ;;  %v1143_v7 = vmov 3  }
  0x15   : > { %1009 = vset.pattern.permute.xlu1 %v1140_v0  ;;  %1008 = vset.pattern.permute.xlu0 %v1140_v0  ;;  %v1144_v8 = vmov 4   ;;  %v1145_v9 = vmov 5   ;;  %v1146_v10 = vmov 6   ;;  %v1147_v11 = vmov 7   ;;  %s1148_s18 = smov [#allocation2]  }
  0x16   : > { %s1236_s30 = sshll.u32 %s1233_s29, 4  ;;  %v307_v12 = vlaneseq  ;;  %s920_s11 = sshll.u32 %s1233_s29, 1  ;;  %vm339_vm2 = vcmask 130048  }
  0x17   : > { %s288_s7 = scalar_lea.vmem %s1545_s1, %s1236_s30  ;;  %s278_s10 = scalar_lea.vmem %s1544_s0, %s1236_s30 }
  0x18   : > { %v302_v1 = vld [vmem:[%s288_s7] sm:$0xff]  ;;  %v301_v3 = vld [vmem:[%s278_s10 + $0x8] sm:$0xff]  ;;  %v310_v13 = vshrl.u32 %v307_v12, 7  ;;  %s298_s14 = scalar_lea.vmem %s1547_s3, %s920_s11  ;;  %v1250_v17 = vand.u32 127, %v307_v12  ;;  %s294_s24 = scalar_lea.vmem %s1546_s2, %s1236_s30 }
  0x19   : > { %328 = vperm.xlu1 %1009, %v302_v1   ;;  %v300_v2 = vld [vmem:[%s278_s10] sm:$0xff]  ;;  %v303_v5 = vld [vmem:[%s288_s7 + $0x8] sm:$0xff]  ;;  %s913_s29 = sshll.u32 %s267_s26, 4  ;;  %s1499_s10 = scalar_lea.sflag [#allocation3], %s267_s26 }
  0x1a   : > { %318 = vperm.xlu0 %1008, %v300_v2   ;;  %v315_v14 = vsub.s32 1, %v310_v13  ;;  %v306_v15 = vld [vmem:[%s298_s14] sm:$0x3]  ;;  %v311_v16 = vsub.s32 0, %v310_v13  ;;  %s269_s30 = scalar_lea.vmem [#allocation2], %s913_s29  ;;  %s1066_s12 = sshll.u32 %s1148_s18, 4  ;;  %s1067_s12 = int_to_ptr.vmem [resolvable:$false] %s1066_s12 }
  0x1b   : > { %s787_s5 = sshll.u32 %s269_s30, 4  ;;  %s1068_s13 = scalar_lea.vmem %s1067_s12, 512  ;;  %s1492_s5 = int_to_ptr.vmem [resolvable:$true] %s787_s5 }
  0x1c   : > { %v1252_v18 = vrot.slane %v306_v15, %v315_v14  ;;  %v1254_v19 = vrot.slane %v306_v15, %v311_v16  ;;  %s1062_s11 = scalar_lea.vmem %s1492_s5, 256  ;;  %p1069_p1 = scmp.lt.s32.totalorder %s1492_s5, %s1067_s12 }
  0x1d   : > { %1010 = vset.pattern.permute.xlu1 %v1141_v4  ;;  %p1063_p12 = scmp.ne.s32.totalorder %s1492_s5, %s1062_s11  ;;  %p1070_p2 = scmp.lt.s32.totalorder %s1068_s13, %s1062_s11 }
  0x1e   : > { %321 = vperm.xlu0 %1008, %v301_v3   ;;  %351 = vperm.xlu1 %1010, %v300_v2  }
  0x1f   : > { %p1064_p13 = pnand %p1063_p12, %p1216_p4  ;;  %p1071_p3 = por %p1070_p2, %p1069_p1 }
  0x21   : > { %p1065_p0 = pneg %p1064_p13 }
  0x22   : > { %1011 = vset.pattern.permute.xlu0 %v1141_v4  ;;  %1012 = vset.pattern.permute.xlu1 %v1140_v0 }
  0x23   : > { %361 = vperm.xlu0 %1011, %v302_v1   ;;  %331 = vperm.xlu1 %1012, %v303_v5   ;;  %p1072_p5 = pnand %p1071_p3, %p1065_p0 }
  0x27   : > { %1013 = vset.pattern.permute.xlu1 %v1141_v4  ;;  %364 = vperm.xlu0 %1011, %v303_v5  }
  0x28   : > { %354 = vperm.xlu1 %1013, %v301_v3  }
  0x2b   : > { %1015 = vset.pattern.permute.xlu0 %v1142_v6 }
  0x2c   : > { %1014 = vset.pattern.permute.xlu1 %v1142_v6  ;;  %393 = vperm.xlu0 %1015, %v302_v1  }
  0x2d   : > { %383 = vperm.xlu1 %1014, %v300_v2  }
  0x30   : > { %1016 = vset.pattern.permute.xlu0 %v1143_v7 }
  0x31   : > { %386 = vperm.xlu1 %1014, %v301_v3   ;;  %415 = vperm.xlu0 %1016, %v300_v2  }
  0x35   : > { %396 = vperm.xlu1 %1014, %v303_v5   ;;  %428 = vperm.xlu0 %1016, %v303_v5  }
  0x39   : > { %1017 = vset.pattern.permute.xlu1 %v1143_v7  ;;  %1019 = vset.pattern.permute.xlu0 %v1144_v8 }
  0x3a   : > { %425 = vperm.xlu1 %1017, %v302_v1   ;;  %457 = vperm.xlu0 %1019, %v302_v1  }
  0x3e   : > { %418 = vperm.xlu1 %1017, %v301_v3   ;;  %1020 = vset.pattern.permute.xlu0 %v1145_v9 }
  0x3f   : > { %479 = vperm.xlu0 %1020, %v300_v2  }
  0x42   : > { %1018 = vset.pattern.permute.xlu1 %v1144_v8 }
  0x43   : > { %447 = vperm.xlu1 %1018, %v300_v2   ;;  %492 = vperm.xlu0 %1020, %v303_v5  }
  0x47   : > { %450 = vperm.xlu1 %1018, %v301_v3   ;;  %1023 = vset.pattern.permute.xlu0 %v1146_v10 }
  0x48   : > { %521 = vperm.xlu0 %1023, %v302_v1  }
  0x4b   : > { %460 = vperm.xlu1 %1018, %v303_v5  }
  0x4c   : > { %1024 = vset.pattern.permute.xlu0 %v1147_v11 }
  0x4d   : > { %543 = vperm.xlu0 %1024, %v300_v2  }
  0x4f   : > { %1021 = vset.pattern.permute.xlu1 %v1145_v9 }
  0x50   : > { %489 = vperm.xlu1 %1021, %v302_v1  }
  0x51   : > { %556 = vperm.xlu0 %1024, %v303_v5  }
  0x54   : > { %482 = vperm.xlu1 %1021, %v301_v3  }
  0x58   : > { %1022 = vset.pattern.permute.xlu1 %v1146_v10 }
  0x59   : > { %511 = vperm.xlu1 %1022, %v300_v2  }
  0x5d   : > { %514 = vperm.xlu1 %1022, %v301_v3  }
  0x61   : > { %524 = vperm.xlu1 %1022, %v303_v5  }
  0x65   : > { %1025 = vset.pattern.permute.xlu1 %v1147_v11 }
  0x66   : > { %553 = vperm.xlu1 %1025, %v302_v1  }
  0x6a   : > { %546 = vperm.xlu1 %1025, %v301_v3  }
  0x94   : > { %v1256_v20 = vpop.permute.xlu1 %328 }
  0x95   : > { %vm333_vm0 = vcmp.eq.s32.totalorder %v1256_v20, %v1250_v17  ;;  %v319_v21 = vpop.permute.xlu0 %318 }
  0x96   : > { %v335_v22 = vsel %vm333_vm0, %v1252_v18, 0.0  ;;  %vm323_vm1 = vcmp.eq.s32.totalorder %v319_v21, %v1250_v17 }
  0x97   : > { %v325_v23 = vsel %vm323_vm1, %v1254_v19, 0.0 }
  0x98   : > { %v337_v24 = vadd.f32 %v335_v22, %v325_v23 }
  0x99   : > { %v352_v25 = vpop.permute.xlu1 %351  ;;  %v322_v26 = vpop.permute.xlu0 %321 }
  0x9a   : > { %v340_v27 = vsel %vm339_vm2, %v337_v24, 0.0  ;;  %vm356_vm3 = vcmp.eq.s32.totalorder %v352_v25, %v1250_v17  ;;  %vm324_vm4 = vcmp.eq.s32.totalorder %v322_v26, %v1250_v17 }
  0x9b   : > { %341 = vadd.xlane.f32.xlu1 %v340_v27  ;;  %v358_v30 = vsel %vm356_vm3, %v1254_v19, 0.0  ;;  %v326_v31 = vsel %vm324_vm4, %v1254_v19, 0.0 }
  0x9e   : > { %v1269_v28 = vpop.permute.xlu0 %361  ;;  %v1271_v29 = vpop.permute.xlu1 %331 }
  0x9f   : > { %vm366_vm5 = vcmp.eq.s32.totalorder %v1269_v28, %v1250_v17  ;;  %vm334_vm6 = vcmp.eq.s32.totalorder %v1271_v29, %v1250_v17 }
  0xa0   : > { %v368_v32 = vsel %vm366_vm5, %v1252_v18, 0.0  ;;  %v336_v33 = vsel %vm334_vm6, %v1252_v18, 0.0 }
  0xa1   : > { %v370_v34 = vadd.f32 %v368_v32, %v358_v30  ;;  %v338_v38 = vadd.f32 %v336_v33, %v326_v31 }
  0xa2   : > { %v1287_v35 = vpop.permute.xlu0 %364 }
  0xa3   : > { %v355_v36 = vpop.permute.xlu1 %354  ;;  %v372_v37 = vsel %vm339_vm2, %v370_v34, 0.0  ;;  %vm367_vm7 = vcmp.eq.s32.totalorder %v1287_v35, %v1250_v17  ;;  %v343_v42 = vsel %vm339_vm2, %v338_v38, 0.0 }
  0xa4   : > { %vm357_vm8 = vcmp.eq.s32.totalorder %v355_v36, %v1250_v17  ;;  %373 = vadd.xlane.f32.xlu0 %v372_v37  ;;  %v369_v39 = vsel %vm367_vm7, %v1252_v18, 0.0 }
  0xa5   : > { %v359_v40 = vsel %vm357_vm8, %v1254_v19, 0.0 }
  0xa6   : > { %v371_v41 = vadd.f32 %v369_v39, %v359_v40 }
  0xa7   : > { %v1299_v43 = vpop.permute.xlu0 %393 }
  0xa8   : > { %344 = vadd.xlane.f32.xlu0 %v343_v42  ;;  %v384_v44 = vpop.permute.xlu1 %383  ;;  %vm398_vm9 = vcmp.eq.s32.totalorder %v1299_v43, %v1250_v17  ;;  %v375_v45 = vsel %vm339_vm2, %v371_v41, 0.0 }
  0xa9   : > { %vm388_vm10 = vcmp.eq.s32.totalorder %v384_v44, %v1250_v17  ;;  %v400_v46 = vsel %vm398_vm9, %v1252_v18, 0.0  ;;  %376 = vadd.xlane.f32.xlu1 %v375_v45 }
  0xaa   : > { %v390_v47 = vsel %vm388_vm10, %v1254_v19, 0.0 }
  0xab   : > { %v402_v48 = vadd.f32 %v400_v46, %v390_v47 }
  0xac   : > { %v387_v49 = vpop.permute.xlu1 %386  ;;  %v416_v50 = vpop.permute.xlu0 %415 }
  0xad   : > { %v404_v51 = vsel %vm339_vm2, %v402_v48, 0.0  ;;  %vm389_vm11 = vcmp.eq.s32.totalorder %v387_v49, %v1250_v17  ;;  %vm420_vm13 = vcmp.eq.s32.totalorder %v416_v50, %v1250_v17 }
  0xae   : > { %405 = vadd.xlane.f32.xlu0 %v404_v51  ;;  %v391_v53 = vsel %vm389_vm11, %v1254_v19, 0.0  ;;  %v422_v58 = vsel %vm420_vm13, %v1254_v19, 0.0 }
  0xb0   : > { %v1312_v52 = vpop.permute.xlu1 %396  ;;  %v1322_v55 = vpop.permute.xlu0 %428 }
  0xb1   : > { %vm399_vm12 = vcmp.eq.s32.totalorder %v1312_v52, %v1250_v17  ;;  %vm431_vm15 = vcmp.eq.s32.totalorder %v1322_v55, %v1250_v17 }
  0xb2   : > { %v401_v54 = vsel %vm399_vm12, %v1252_v18, 0.0  ;;  %v433_v0 = vsel %vm431_vm15, %v1252_v18, 0.0 }
  0xb3   : > { %v403_v56 = vadd.f32 %v401_v54, %v391_v53 }
  0xb5   : > { %v1324_v57 = vpop.permute.xlu1 %425  ;;  %v407_v59 = vsel %vm339_vm2, %v403_v56, 0.0  ;;  %v1336_v62 = vpop.permute.xlu0 %457 }
  0xb6   : > { %vm430_vm14 = vcmp.eq.s32.totalorder %v1324_v57, %v1250_v17  ;;  %408 = vadd.xlane.f32.xlu1 %v407_v59  ;;  %vm462_vm3 = vcmp.eq.s32.totalorder %v1336_v62, %v1250_v17 }
  0xb7   : > { %v432_v60 = vsel %vm430_vm14, %v1252_v18, 0.0  ;;  %v464_v5 = vsel %vm462_vm3, %v1252_v18, 0.0 }
  0xb8   : > { %v434_v61 = vadd.f32 %v432_v60, %v422_v58 }
  0xb9   : > { %v419_v63 = vpop.permute.xlu1 %418 }
  0xba   : > { %vm421_vm1 = vcmp.eq.s32.totalorder %v419_v63, %v1250_v17  ;;  %v436_v1 = vsel %vm339_vm2, %v434_v61, 0.0  ;;  %v480_v10 = vpop.permute.xlu0 %479 }
  0xbb   : > { %v423_v2 = vsel %vm421_vm1, %v1254_v19, 0.0  ;;  %437 = vadd.xlane.f32.xlu0 %v436_v1  ;;  %vm484_vm11 = vcmp.eq.s32.totalorder %v480_v10, %v1250_v17  ;;  %v304_v1 = vld [vmem:[%s294_s24] sm:$0xff] }
  0xbc   : > { %v435_v3 = vadd.f32 %v433_v0, %v423_v2  ;;  %v486_v22 = vsel %vm484_vm11, %v1254_v19, 0.0  ;;  %v305_v0 = vld [vmem:[%s294_s24 + $0x8] sm:$0xff] }
  0xbd   : > { %936 = vmatprep.subr.mxu0 %v305_v0 }
  0xbe   : > { %v448_v4 = vpop.permute.xlu1 %447  ;;  %v439_v6 = vsel %vm339_vm2, %v435_v3, 0.0  ;;  %v1366_v15 = vpop.permute.xlu0 %492  ;;  %937 = vmatpush3.msra.mxu0 %v305_v0 }
  0xbf   : > { %vm452_vm4 = vcmp.eq.s32.totalorder %v448_v4, %v1250_v17  ;;  %440 = vadd.xlane.f32.xlu1 %v439_v6  ;;  %vm1549_vm1 = vcmp.eq.s32.totalorder %v1366_v15, %v1250_v17  ;;  %938 = vmatprep.subr.mxu0 %v304_v1 }
  0xc0   : > { %v454_v7 = vsel %vm452_vm4, %v1254_v19, 0.0  ;;  %v497_v30 = vsel %vm1549_vm1, %v1252_v18, 0.0  ;;  %939 = vmatpush3.msra.mxu0 %v304_v1 }
  0xc1   : > { %v466_v8 = vadd.f32 %v464_v5, %v454_v7 }
  0xc2   : > { %v451_v9 = vpop.permute.xlu1 %450 }
  0xc3   : > { %v468_v11 = vsel %vm339_vm2, %v466_v8, 0.0  ;;  %vm453_vm8 = vcmp.eq.s32.totalorder %v451_v9, %v1250_v17  ;;  %v1380_v26 = vpop.permute.xlu0 %521 }
  0xc4   : > { %469 = vadd.xlane.f32.xlu0 %v468_v11  ;;  %v455_v13 = vsel %vm453_vm8, %v1254_v19, 0.0  ;;  %vm526_vm8 = vcmp.eq.s32.totalorder %v1380_v26, %v1250_v17 }
  0xc5   : > { %v528_v36 = vsel %vm526_vm8, %v1252_v18, 0.0 }
  0xc6   : > { %v1356_v12 = vpop.permute.xlu1 %460 }
  0xc7   : > { %vm463_vm10 = vcmp.eq.s32.totalorder %v1356_v12, %v1250_v17 }
  0xc8   : > { %v465_v14 = vsel %vm463_vm10, %v1252_v18, 0.0  ;;  %v544_v42 = vpop.permute.xlu0 %543 }
  0xc9   : > { %v467_v16 = vadd.f32 %v465_v14, %v455_v13 }
  0xcb   : > { %v1368_v21 = vpop.permute.xlu1 %489  ;;  %v471_v23 = vsel %vm339_vm2, %v467_v16, 0.0 }
  0xcc   : > { %vm494_vm13 = vcmp.eq.s32.totalorder %v1368_v21, %v1250_v17  ;;  %472 = vadd.xlane.f32.xlu1 %v471_v23  ;;  %v1413_v50 = vpop.permute.xlu0 %556 }
  0xcd   : > { %v496_v24 = vsel %vm494_vm13, %v1252_v18, 0.0 }
  0xce   : > { %v498_v25 = vadd.f32 %v496_v24, %v486_v22 }
  0xcf   : > { %v483_v27 = vpop.permute.xlu1 %482 }
  0xd0   : > { %vm485_vm4 = vcmp.eq.s32.totalorder %v483_v27, %v1250_v17  ;;  %v500_v31 = vsel %vm339_vm2, %v498_v25, 0.0 }
  0xd1   : > { %v487_v32 = vsel %vm485_vm4, %v1254_v19, 0.0  ;;  %501 = vadd.xlane.f32.xlu0 %v500_v31 }
  0xd2   : > { %v499_v33 = vadd.f32 %v497_v30, %v487_v32 }
  0xd4   : > { %v512_v34 = vpop.permute.xlu1 %511  ;;  %v503_v37 = vsel %vm339_vm2, %v499_v33, 0.0 }
  0xd5   : > { %vm516_vm11 = vcmp.eq.s32.totalorder %v512_v34, %v1250_v17  ;;  %504 = vadd.xlane.f32.xlu1 %v503_v37 }
  0xd6   : > { %v518_v38 = vsel %vm516_vm11, %v1254_v19, 0.0  ;;  %vm548_vm11 = vcmp.eq.s32.totalorder %v544_v42, %v1250_v17 }
  0xd7   : > { %v530_v39 = vadd.f32 %v528_v36, %v518_v38  ;;  %v550_v48 = vsel %vm548_vm11, %v1254_v19, 0.0 }
  0xd8   : > { %v515_v40 = vpop.permute.xlu1 %514 }
  0xd9   : > { %v532_v41 = vsel %vm339_vm2, %v530_v39, 0.0  ;;  %vm517_vm4 = vcmp.eq.s32.totalorder %v515_v40, %v1250_v17 }
  0xda   : > { %533 = vadd.xlane.f32.xlu0 %v532_v41  ;;  %v519_v45 = vsel %vm517_vm4, %v1254_v19, 0.0 }
  0xdc   : > { %v1400_v44 = vpop.permute.xlu1 %524 }
  0xdd   : > { %vm1550_vm1 = vcmp.eq.s32.totalorder %v1400_v44, %v1250_v17 }
  0xde   : > { %v529_v46 = vsel %vm1550_vm1, %v1252_v18, 0.0  ;;  %vm559_vm1 = vcmp.eq.s32.totalorder %v1413_v50, %v1250_v17 }
  0xdf   : > { %v531_v47 = vadd.f32 %v529_v46, %v519_v45  ;;  %v561_v59 = vsel %vm559_vm1, %v1252_v18, 0.0 }
  0xe1   : > { %v1411_v49 = vpop.permute.xlu1 %553  ;;  %v535_v51 = vsel %vm339_vm2, %v531_v47, 0.0 }
  0xe2   : > { %vm558_vm4 = vcmp.eq.s32.totalorder %v1411_v49, %v1250_v17  ;;  %536 = vadd.xlane.f32.xlu1 %v535_v51 }
  0xe3   : > { %v560_v53 = vsel %vm558_vm4, %v1252_v18, 0.0 }
  0xe4   : > { %v562_v54 = vadd.f32 %v560_v53, %v550_v48 }
  0xe5   : > { %v547_v56 = vpop.permute.xlu1 %546 }
  0xe6   : > { %vm549_vm11 = vcmp.eq.s32.totalorder %v547_v56, %v1250_v17  ;;  %v564_v58 = vsel %vm339_vm2, %v562_v54, 0.0 }
  0xe7   : > { %v551_v60 = vsel %vm549_vm11, %v1254_v19, 0.0  ;;  %565 = vadd.xlane.f32.xlu0 %v564_v58 }
  0xe8   : > { %v563_v61 = vadd.f32 %v561_v59, %v551_v60 }
  0xea   : > { %v567_v63 = vsel %vm339_vm2, %v563_v61, 0.0 }
  0xeb   : > { %568 = vadd.xlane.f32.xlu1 %v567_v63 }
 0x124   : > { %v342_v3 = vpop.xlane.xlu1 %341 }
 0x125   : > { %v346_v10 = vmul.f32 0.2, %v342_v3 }
 0x127   : > { %v348_v27 = vmax.f32 %v342_v3, %v346_v10 }
 0x12d   : > { %v374_v2 = vpop.xlane.xlu0 %373 }
 0x12e   : > { %v378_v9 = vmul.f32 0.2, %v374_v2 }
 0x130   : > { %v380_v22 = vmax.f32 %v374_v2, %v378_v9 }
 0x131   : > { %v345_v18 = vpop.xlane.xlu0 %344 }
 0x132   : > { %v377_v4 = vpop.xlane.xlu1 %376  ;;  %v347_v24 = vmul.f32 0.2, %v345_v18  ;;  %v574_v37 = vmax.f32 %v348_v27, %v380_v22 }
 0x133   : > { %v379_v14 = vmul.f32 0.2, %v377_v4 }
 0x134   : > { %v349_v40 = vmax.f32 %v345_v18, %v347_v24 }
 0x135   : > { %v1436_v33 = vmax.f32 %v377_v4, %v379_v14 }
 0x137   : > { %v406_v19 = vpop.xlane.xlu0 %405  ;;  %v575_v51 = vmax.f32 %v349_v40, %v1436_v33 }
 0x138   : > { %v410_v11 = vmul.f32 0.2, %v406_v19 }
 0x13a   : > { %v412_v30 = vmax.f32 %v406_v19, %v410_v11 }
 0x13c   : > { %v576_v45 = vmax.f32 %v574_v37, %v412_v30 }
 0x13f   : > { %v409_v5 = vpop.xlane.xlu1 %408 }
 0x140   : > { %v411_v25 = vmul.f32 0.2, %v409_v5 }
 0x142   : > { %v413_v41 = vmax.f32 %v409_v5, %v411_v25 }
 0x144   : > { %v438_v6 = vpop.xlane.xlu0 %437  ;;  %v577_v59 = vmax.f32 %v575_v51, %v413_v41 }
 0x145   : > { %v442_v23 = vmul.f32 0.2, %v438_v6 }
 0x147   : > { %v444_v38 = vmax.f32 %v438_v6, %v442_v23 }
 0x148   : > { %v441_v7 = vpop.xlane.xlu1 %440 }
 0x149   : > { %v443_v34 = vmul.f32 0.2, %v441_v7  ;;  %v578_v56 = vmax.f32 %v576_v45, %v444_v38 }
 0x14b   : > { %v445_v53 = vmax.f32 %v441_v7, %v443_v34 }
 0x14d   : > { %v470_v8 = vpop.xlane.xlu0 %469  ;;  %v579_v1 = vmax.f32 %v577_v59, %v445_v53 }
 0x14e   : > { %v474_v31 = vmul.f32 0.2, %v470_v8 }
 0x150   : > { %v476_v46 = vmax.f32 %v470_v8, %v474_v31 }
 0x152   : > { %v580_v63 = vmax.f32 %v578_v56, %v476_v46 }
 0x155   : > { %v473_v13 = vpop.xlane.xlu1 %472 }
 0x156   : > { %v475_v42 = vmul.f32 0.2, %v473_v13 }
 0x158   : > { %v477_v60 = vmax.f32 %v473_v13, %v475_v42 }
 0x15a   : > { %v502_v16 = vpop.xlane.xlu0 %501  ;;  %v581_v19 = vmax.f32 %v579_v1, %v477_v60 }
 0x15b   : > { %v506_v39 = vmul.f32 0.2, %v502_v16 }
 0x15d   : > { %v508_v58 = vmax.f32 %v502_v16, %v506_v39 }
 0x15e   : > { %v505_v32 = vpop.xlane.xlu1 %504 }
 0x15f   : > { %v507_v54 = vmul.f32 0.2, %v505_v32  ;;  %v582_v18 = vmax.f32 %v580_v63, %v508_v58 }
 0x161   : > { %v509_v2 = vmax.f32 %v505_v32, %v507_v54 }
 0x163   : > { %v534_v36 = vpop.xlane.xlu0 %533  ;;  %v583_v9 = vmax.f32 %v581_v19, %v509_v2 }
 0x164   : > { %v538_v47 = vmul.f32 0.2, %v534_v36 }
 0x166   : > { %v540_v0 = vmax.f32 %v534_v36, %v538_v47 }
 0x168   : > { %v584_v6 = vmax.f32 %v582_v18, %v540_v0 }
 0x16b   : > { %v537_v48 = vpop.xlane.xlu1 %536 }
 0x16c   : > { %v539_v61 = vmul.f32 0.2, %v537_v48 }
 0x16e   : > { %v541_v5 = vmax.f32 %v537_v48, %v539_v61 }
 0x170   : > { %v566_v3 = vpop.xlane.xlu0 %565  ;;  %v585_v14 = vmax.f32 %v583_v9, %v541_v5 }
 0x171   : > { %v570_v4 = vmul.f32 0.2, %v566_v3 }
 0x173   : > { %v572_v8 = vmax.f32 %v566_v3, %v570_v4 }
 0x174   : > { %v569_v10 = vpop.xlane.xlu1 %568 }
 0x175   : > { %v586_v7 = vmax.f32 %v584_v6, %v572_v8  ;;  %v571_v11 = vmul.f32 0.2, %v569_v10 }
 0x177   : > { %v630_v16 = vsub.f32 %v572_v8, %v586_v7  ;;  %v573_v23 = vmax.f32 %v569_v10, %v571_v11  ;;  %v588_v13 = vsub.f32 %v348_v27, %v586_v7  ;;  %v594_v24 = vsub.f32 %v380_v22, %v586_v7 }
 0x178   : > { %v600_v25 = vsub.f32 %v412_v30, %v586_v7  ;;  %v606_v31 = vsub.f32 %v444_v38, %v586_v7  ;;  %v612_v37 = vsub.f32 %v476_v46, %v586_v7  ;;  %v618_v42 = vsub.f32 %v508_v58, %v586_v7 }
 0x179   : > { %v587_v34 = vmax.f32 %v585_v14, %v573_v23  ;;  %v590_v32 = vmul.f32 1.442695, %v588_v13  ;;  %v596_v36 = vmul.f32 1.442695, %v594_v24  ;;  %v632_v45 = vmul.f32 1.442695, %v630_v16 }
 0x17a   : > { %v602_v39 = vmul.f32 1.442695, %v600_v25  ;;  %v624_v47 = vsub.f32 %v540_v0, %v586_v7  ;;  %v608_v51 = vmul.f32 1.442695, %v606_v31  ;;  %v614_v56 = vmul.f32 1.442695, %v612_v37 }
 0x17b   : > { %v589_v48 = vsub.f32 %v349_v40, %v587_v34  ;;  %1026 = vpow2.f32 %v590_v32  ;;  %v595_v54 = vsub.f32 %v1436_v33, %v587_v34  ;;  %v620_v27 = vmul.f32 1.442695, %v618_v42 }
 0x17c   : > { %1028 = vpow2.f32 %v596_v36  ;;  %v601_v22 = vsub.f32 %v413_v41, %v587_v34  ;;  %v626_v30 = vmul.f32 1.442695, %v624_v47  ;;  %v607_v38 = vsub.f32 %v445_v53, %v587_v34 }
 0x17d   : > { %1030 = vpow2.f32 %v602_v39  ;;  %v592_v59 = vmul.f32 1.442695, %v589_v48  ;;  %v598_v46 = vmul.f32 1.442695, %v595_v54  ;;  %v613_v58 = vsub.f32 %v477_v60, %v587_v34 }
 0x17e   : > { %1032 = vpow2.f32 %v632_v45  ;;  %v604_v61 = vmul.f32 1.442695, %v601_v22  ;;  %v610_v40 = vmul.f32 1.442695, %v607_v38  ;;  %v619_v63 = vsub.f32 %v509_v2, %v587_v34 }
 0x17f   : > { %1034 = vpow2.f32 %v608_v51  ;;  %v616_v33 = vmul.f32 1.442695, %v613_v58  ;;  %v625_v0 = vsub.f32 %v541_v5, %v587_v34  ;;  %v631_v1 = vsub.f32 %v573_v23, %v587_v34 }
 0x180   : > { %1036 = vpow2.f32 %v614_v56  ;;  %v622_v41 = vmul.f32 1.442695, %v619_v63 }
 0x181   : > { %1038 = vpow2.f32 %v620_v27  ;;  %v628_v53 = vmul.f32 1.442695, %v625_v0  ;;  %v634_v19 = vmul.f32 1.442695, %v631_v1 }
 0x182   : > { %1040 = vpow2.f32 %v626_v30 }
 0x183   : > { %1042 = vpow2.f32 %v592_v59 }
 0x184   : > { %1044 = vpow2.f32 %v598_v46 }
 0x185   : > { %1046 = vpow2.f32 %v604_v61 }
 0x186   : > { %1048 = vpow2.f32 %v610_v40 }
 0x187   : > { %1050 = vpow2.f32 %v616_v33 }
 0x188   : > { %v1027_v3 = vpop.eup %1026  ;;  %1052 = vpow2.f32 %v622_v41 }
 0x189   : > { %v1029_v18 = vpop.eup %1028  ;;  %v650_v60 = vsel %vm333_vm0, %v1027_v3, 0.0  ;;  %1054 = vpow2.f32 %v628_v53  ;;  %vm1553_vm0 = vcmp.eq.s32.totalorder %v1366_v15, %v1250_v17 }
 0x18a   : > { %v1031_v4 = vpop.eup %1030  ;;  %v654_v2 = vsel %vm366_vm5, %v1029_v18, 0.0  ;;  %v636_v5 = vadd.f32 %v1029_v18, %v1027_v3  ;;  %1056 = vpow2.f32 %v634_v19  ;;  %vm1554_vm5 = vcmp.eq.s32.totalorder %v1400_v44, %v1250_v17 }
 0x18b   : > { %v1033_v6 = vpop.eup %1032  ;;  %v656_v8 = vadd.f32 %v654_v2, %v650_v60  ;;  %v658_v10 = vsel %vm398_vm9, %v1031_v4, 0.0 }
 0x18c   : > { %v1035_v9 = vpop.eup %1034  ;;  %v638_v7 = vadd.f32 %v1031_v4, %v636_v5  ;;  %v678_v35 = vsel %vm558_vm4, %v1033_v6, 0.0 }
 0x18d   : > { %v1037_v11 = vpop.eup %1036  ;;  %v660_v20 = vadd.f32 %v658_v10, %v656_v8  ;;  %v662_v28 = vsel %vm430_vm14, %v1035_v9, 0.0 }
 0x18e   : > { %v1039_v14 = vpop.eup %1038  ;;  %v640_v16 = vadd.f32 %v1035_v9, %v638_v7  ;;  %v666_v25 = vsel %vm462_vm3, %v1037_v11, 0.0 }
 0x18f   : > { %v1041_v23 = vpop.eup %1040  ;;  %v664_v13 = vadd.f32 %v662_v28, %v660_v20  ;;  %v670_v57 = vsel %vm494_vm13, %v1039_v14, 0.0 }
 0x190   : > { %v1043_v24 = vpop.eup %1042  ;;  %v642_v43 = vadd.f32 %v1037_v11, %v640_v16  ;;  %v674_v48 = vsel %vm526_vm8, %v1041_v23, 0.0 }
 0x191   : > { %v1045_v31 = vpop.eup %1044  ;;  %v668_v34 = vadd.f32 %v666_v25, %v664_v13  ;;  %v651_v32 = vsel %vm334_vm6, %v1043_v24, 0.0 }
 0x192   : > { %v1047_v36 = vpop.eup %1046  ;;  %v655_v37 = vsel %vm367_vm7, %v1045_v31, 0.0  ;;  %v637_v39 = vadd.f32 %v1045_v31, %v1043_v24  ;;  %v644_v42 = vadd.f32 %v1039_v14, %v642_v43 }
 0x193   : > { %v1049_v62 = vpop.eup %1048  ;;  %v672_v45 = vadd.f32 %v670_v57, %v668_v34  ;;  %v657_v47 = vadd.f32 %v655_v37, %v651_v32  ;;  %v659_v29 = vsel %vm399_vm12, %v1047_v36, 0.0 }
 0x194   : > { %v639_v51 = vadd.f32 %v1047_v36, %v637_v39  ;;  %v646_v21 = vadd.f32 %v1041_v23, %v644_v42  ;;  %v1051_v54 = vpop.eup %1050  ;;  %v663_v22 = vsel %vm431_vm15, %v1049_v62, 0.0 }
 0x195   : > { %v676_v56 = vadd.f32 %v674_v48, %v672_v45  ;;  %v661_v27 = vadd.f32 %v659_v29, %v657_v47  ;;  %v1053_v38 = vpop.eup %1052  ;;  %v667_v52 = vsel %vm463_vm10, %v1051_v54, 0.0 }
 0x196   : > { %v641_v30 = vadd.f32 %v1049_v62, %v639_v51  ;;  %v648_v26 = vadd.f32 %v1033_v6, %v646_v21  ;;  %v1055_v61 = vpop.eup %1054  ;;  %v671_v55 = vsel %vm1553_vm0, %v1053_v38, 0.0 }
 0x197   : > { %v680_v59 = vadd.f32 %v678_v35, %v676_v56  ;;  %v665_v46 = vadd.f32 %v663_v22, %v661_v27  ;;  %v1057_v63 = vpop.eup %1056  ;;  %v675_v0 = vsel %vm1554_vm5, %v1055_v61, 0.0 }
 0x198   : > { %v643_v58 = vadd.f32 %v1051_v54, %v641_v30  ;;  %v679_v41 = vsel %vm559_vm1, %v1057_v63, 0.0 }
 0x199   : > { %940 = vmatprep.mubr.msk.f32.mxu0 %vm339_vm2, %v680_v59  ;;  %v669_v49 = vadd.f32 %v667_v52, %v665_v46 }
 0x19a   : > { %v645_v40 = vadd.f32 %v1053_v38, %v643_v58 }
 0x19b   : > { %v673_v33 = vadd.f32 %v671_v55, %v669_v49 }
 0x19c   : > { %v647_v12 = vadd.f32 %v1055_v61, %v645_v40 }
 0x19d   : > { %v677_v1 = vadd.f32 %v675_v0, %v673_v33 }
 0x19e   : > { %v649_v3 = vadd.f32 %v1057_v63, %v647_v12 }
 0x19f   : > { %v681_v53 = vadd.f32 %v679_v41, %v677_v1 }
 0x1a0   : > { %1058 = vrcp.f32 %v649_v3 }
 0x1a1   : > { %941 = vmatmul.mubr.msk.f32.vlgmr.msra.gmra.mxu0 %vm339_vm2, %v681_v53  ;;  %1060 = vrcp.f32 %v648_v26 }
 0x1ad   : > { %v1059_v15 = vpop.eup %1058 }
 0x1ae   : > { %v1061_v60 = vpop.eup %1060 }
 0x261   : > { %v942_v44 = vpop.f32.mrf.mxu0 }
 0x262   : > { %v768_v18 = vmul.f32 %v1059_v15, %v942_v44 }
 0x263   : > { %v754_v17 = vpop.f32.mrf.mxu0 }
 0x264   : > { %770 = vst [vmem:[%s269_s30 + $0x8] sm:$0xff] %v768_v18  ;;  %v767_v50 = vmul.f32 %v1061_v60, %v754_v17 }
 0x266   : > { %769 = vst [vmem:[%s269_s30] sm:$0xff] %v767_v50 }
 0x267   : > { %1075 = shalt.err (!%p1072_p5)
}
 0x268   : > { %s1076_s14 = scalar_lea.hbm %s1497_s9, 256  ;;  %s1080_s24 = scalar_lea.hbm %s1548_s4, 512 }
 0x269   : > { %p1077_p6 = scmp.ne.s32.totalorder %s1497_s9, %s1076_s14  ;;  %p1081_p10 = scmp.lt.s32.totalorder %s1497_s9, %s1548_s4 }
 0x26a   : > { %p1082_p11 = scmp.lt.s32.totalorder %s1080_s24, %s1076_s14 }
 0x26b   : > { %p1078_p7 = pnand %p1077_p6, %p1216_p4 }
 0x26c   : > { %p1083_p12 = por %p1082_p11, %p1081_p10 }
 0x26d   : > { %p1079_p9 = pneg %p1078_p7 }
 0x26f   : > { %p1084_p13 = pnand %p1083_p12, %p1079_p9 }
 0x271   : > { %1087 = shalt.err (!%p1084_p13)
}
 0x272   : > { %s1149_s30 = smov 128   ;;  %s1150_s6 = smov 8  }
 0x273   : > { %943 = dma.vmem_to_hbm [thread:$0]  (%p1216_p4), %s1492_s5, 256, %s1497_s9, %s1499_s10, %s1149_s30, %s1149_s30, %s1150_s6  }
 0x274 PF: > { %p949_p0 = scmp.ge.s32.totalorder %s1138_s20, 2  ;;  %s802_s7 = sand.u32 1, %s1118_s15  }
 0x275   : > { %s803_s8 = scalar_lea.sflag [#allocation3], %s802_s7 }
 0x276   : > { %p946_p1 = pnand %p949_p0, %p1223_p8 }
 0x278   : > { %p947_p2 = pneg %p946_p1 }
 0x27a   : > { %1113 = dma.done.wait (%p947_p2), %s803_s8, 256  }
 0x27b   : > { %1115 = vsyncadd (%p947_p2), %s803_s8, 4294967040  ;;  %s17_s20 = sadd.s32 1, %s1138_s20   ;;  %s1555_s15 = smov %s1122_s16 }
 0x27c   : > { %p14_p3 = scmp.ge.s32.totalorder %s17_s20, 4   ;;  %s1556_s16 = smov %s1126_s17 }
 0x27d   : > { %s1557_s17 = smov %s1229_s28  ;;  %s1558_s18 = smov %s1134_s19 }
 0x27e   : > { %s1559_s19 = smov %s1561_s23  ;;  %16 = sbr.rel (!%p14_p3) target bundleno = 4 (0x4), region = 80 }
 0x283   :  { %808 = vsyncpa [#allocation3], 1 }
 0x284   :  { %810 = vsyncpa [#allocation3 + $0x1], 1 }

</bundles_post_ra>
